<compile_context>
chip_gen: v7x
topology: tpu7x:2x2x1
jax: 0.10.0
libtpu: 0.0.40
codegen_flags: <defaults>
</compile_context>

<pallas_src>
import functools

import jax
import jax.numpy as jnp
from jax.experimental import pallas as pl
from jax.experimental.pallas import tpu as pltpu

TASK_WEIGHTS = {"text": 0.5, "audio": 0.5}

# Below this many elements the pallas_call launch overhead dominates; use plain XLA.
_PALLAS_MIN_ELEMENTS = 1 << 16


def _round_down_mult(x, m):
    return (x // m) * m


def _pick_tile_b(B, C, in_itemsize, vmem_budget_bytes=12 * 1024 * 1024):
    """Rows per tile: multiple of 8, sized so 3 streams x 2 pipeline buffers fit the budget."""
    if B < 8:
        return B  # full-extent block (< 8 sublanes allowed only when equal to the full dim)
    bytes_per_row = 3 * 2 * C * in_itemsize  # 3 inputs, double-buffered
    cap = max(8, vmem_budget_bytes // max(bytes_per_row, 1))
    tile_b = min(cap, 512, B)
    tile_b = max(8, _round_down_mult(tile_b, 8))
    return int(tile_b)


def _multimodal_bce_partial_kernel(text_ref, audio_ref, labels_ref, out_ref,
                                   *, total_rows, tile_b, needs_mask):
    """Per-tile partial sums of the BCE-with-logits terms for both modalities.

    out_ref: (1, 2, C) -- index 0 = text partial (summed over tile rows), 1 = audio partial.
    """
    t = text_ref[...].astype(jnp.float32)
    a = audio_ref[...].astype(jnp.float32)
    y = labels_ref[...].astype(jnp.float32)

    def bce_terms(x):
        # Numerically stable BCEWithLogits per-element terms (same formula PyTorch uses).
        return jnp.maximum(x, 0.0) - x * y + jnp.log1p(jnp.exp(-jnp.abs(x)))

    bt = bce_terms(t)
    ba = bce_terms(a)

    if needs_mask:
        # Ragged trailing tile: zero out rows past the true batch size so the
        # global-mean divisor (B*C) stays unbiased.
        i = pl.program_id(0)
        row = jax.lax.broadcasted_iota(jnp.int32, bt.shape, 0)
        valid = (i * tile_b + row) < total_rows
        zero = jnp.zeros_like(bt)
        bt = jnp.where(valid, bt, zero)
        ba = jnp.where(valid, ba, zero)

    # Sublane-only reduction in-kernel; the cheap cross-lane reduce happens once in the wrapper.
    out_ref[0, 0:1, :] = jnp.sum(bt, axis=0, keepdims=True)
    out_ref[0, 1:2, :] = jnp.sum(ba, axis=0, keepdims=True)


def multimodal_loss_pallas(text_logits, audio_logits, labels, task_weights=None):
    """Pallas TPU kernel path. Inputs: [B, C] float (f32 or bf16). Returns scalar f32."""
    if task_weights is None:
        task_weights = TASK_WEIGHTS
    assert text_logits.shape == audio_logits.shape == labels.shape
    assert text_logits.ndim == 2
    B, C = text_logits.shape

    in_itemsize = max(jnp.dtype(x.dtype).itemsize
                      for x in (text_logits, audio_logits, labels))
    tile_b = _pick_tile_b(B, C, in_itemsize)
    num_blocks = pl.cdiv(B, tile_b)
    needs_mask = (B % tile_b) != 0

    kernel = functools.partial(
        _multimodal_bce_partial_kernel,
        total_rows=B, tile_b=tile_b, needs_mask=needs_mask)

    in_spec = pl.BlockSpec((tile_b, C), lambda i: (i, 0))
    # Output block's last-two dims (2, C) equal the full array's last-two dims -> valid layout.
    out_spec = pl.BlockSpec((1, 2, C), lambda i: (i, 0, 0))

    # VMEM footprint: 3 double-buffered input tiles + tiny output + f32 temporaries.
    dma_bytes = 3 * 2 * tile_b * C * in_itemsize + 2 * 2 * C * 4
    tile_f32_bytes = tile_b * C * 4
    vmem_limit = int(min(48 * 1024 * 1024,
                         max(16 * 1024 * 1024, dma_bytes + 8 * tile_f32_bytes)))

    partials = pl.pallas_call(
        kernel,
        out_shape=jax.ShapeDtypeStruct((num_blocks, 2, C), jnp.float32),
        grid=(num_blocks,),
        in_specs=[in_spec, in_spec, in_spec],
        out_specs=out_spec,
        compiler_params=pltpu.CompilerParams(
            dimension_semantics=("parallel",),   # no cross-step accumulator -> megacore-safe
            vmem_limit_bytes=vmem_limit),
    )(text_logits, audio_logits, labels)

    # Epilogue: one cross-lane reduce over the small partial array + a single fused scale.
    text_sum = jnp.sum(partials[:, 0, :])
    audio_sum = jnp.sum(partials[:, 1, :])
    inv_n = jnp.float32(1.0) / jnp.float32(B * C)
    w_t = jnp.float32(task_weights["text"])
    w_a = jnp.float32(task_weights["audio"])
    return (w_t * text_sum + w_a * audio_sum) * inv_n


def _reference_loss(text_logits, audio_logits, labels, task_weights=None):
    """Pure-JAX reference (also the fast path for tiny problems)."""
    if task_weights is None:
        task_weights = TASK_WEIGHTS

    def bce(x, y):
        x = x.astype(jnp.float32)
        y = y.astype(jnp.float32)
        return jnp.mean(jnp.maximum(x, 0.0) - x * y + jnp.log1p(jnp.exp(-jnp.abs(x))))

    return (task_weights["text"] * bce(text_logits, labels)
            + task_weights["audio"] * bce(audio_logits, labels))


def multimodal_loss(text_logits, audio_logits, labels, task_weights=None):
    """Shape-based dispatch: XLA-fused path for tiny inputs, Pallas kernel otherwise.

    Accepts any common shape (flattened to 2D with the last axis as lanes), matching
    nn.BCEWithLogitsLoss which reduces over all elements.
    """
    if text_logits.ndim == 1:
        reshape = lambda x: x.reshape(1, -1)
    elif text_logits.ndim == 2:
        reshape = lambda x: x
    else:
        last = text_logits.shape[-1]
        reshape = lambda x: x.reshape(-1, last)
    t, a, y = reshape(text_logits), reshape(audio_logits), reshape(labels)
    B, C = t.shape
    if B * C < _PALLAS_MIN_ELEMENTS:
        return _reference_loss(t, a, y, task_weights)
    return multimodal_loss_pallas(t, a, y, task_weights)


if __name__ == "__main__":
    key = jax.random.PRNGKey(0)
    k1, k2, k3, k4, k5, k6 = jax.random.split(key, 6)

    # Small lane-friendly shapes: batch=8, num_classes=128.
    B, C = 8, 128
    text = jax.random.normal(k1, (B, C), dtype=jnp.float32)
    audio = jax.random.normal(k2, (B, C), dtype=jnp.float32)
    labels = (jax.random.uniform(k3, (B, C)) > 0.5).astype(jnp.float32)

    out = jax.block_until_ready(multimodal_loss_pallas(text, audio, labels))
    ref = _reference_loss(text, audio, labels)
    assert jnp.allclose(out, ref, atol=1e-5, rtol=1e-5), (out, ref)

    # Ragged batch (B not a multiple of the row tile) exercises the in-kernel tail mask.
    B2, C2 = 20, 256
    text2 = jax.random.normal(k4, (B2, C2), dtype=jnp.float32)
    audio2 = jax.random.normal(k5, (B2, C2), dtype=jnp.float32)
    labels2 = (jax.random.uniform(k6, (B2, C2)) > 0.5).astype(jnp.float32)

    out2 = jax.block_until_ready(multimodal_loss_pallas(text2, audio2, labels2))
    ref2 = _reference_loss(text2, audio2, labels2)
    assert jnp.allclose(out2, ref2, atol=1e-5, rtol=1e-5), (out2, ref2)

    # bf16 inputs (halved HBM traffic path) through the dispatching wrapper.
    text3 = text2.astype(jnp.bfloat16)
    audio3 = audio2.astype(jnp.bfloat16)
    out3 = jax.block_until_ready(multimodal_loss_pallas(text3, audio3, labels2))
    ref3 = _reference_loss(text3, audio3, labels2)
    assert jnp.allclose(out3, ref3, atol=1e-3, rtol=1e-3), (out3, ref3)

    print("KERNEL_OK")
</pallas_src>

<mosaic_0001>
module attributes {stable_mosaic.version = 11 : i64} {
  func.func @_multimodal_bce_partial_kernel(%arg0: i32, %arg1: memref<8x128xf32, #tpu.memory_space<vmem>>, %arg2: memref<8x128xf32, #tpu.memory_space<vmem>>, %arg3: memref<8x128xf32, #tpu.memory_space<vmem>>, %arg4: memref<1x2x128xf32, #tpu.memory_space<vmem>>) attributes {dimension_semantics = [#tpu.dimension_semantics<parallel>], iteration_bounds = array<i64: 1>, scalar_prefetch = 0 : i64, scratch_operands = 0 : i64, tpu.core_type = #tpu.core_type<tc>, window_params = [{transform_indices = @transform_0, window_bounds = array<i64: 8, 128>}, {transform_indices = @transform_1, window_bounds = array<i64: 8, 128>}, {transform_indices = @transform_2, window_bounds = array<i64: 8, 128>}, {transform_indices = @transform_3, window_bounds = array<i64: 1, 2, 128>}]} {
    %c0 = arith.constant 0 : index
    %c0_0 = arith.constant 0 : index
    %0 = vector.load %arg1[%c0, %c0_0] : memref<8x128xf32, #tpu.memory_space<vmem>>, vector<8x128xf32>
    %c0_1 = arith.constant 0 : index
    %c0_2 = arith.constant 0 : index
    %1 = vector.load %arg2[%c0_1, %c0_2] : memref<8x128xf32, #tpu.memory_space<vmem>>, vector<8x128xf32>
    %c0_3 = arith.constant 0 : index
    %c0_4 = arith.constant 0 : index
    %2 = vector.load %arg3[%c0_3, %c0_4] : memref<8x128xf32, #tpu.memory_space<vmem>>, vector<8x128xf32>
    %cst = arith.constant 0.000000e+00 : f32
    %3 = vector.broadcast %cst : f32 to vector<8x128xf32>
    %4 = arith.maximumf %0, %3 : vector<8x128xf32>
    %5 = arith.mulf %0, %2 : vector<8x128xf32>
    %6 = arith.subf %4, %5 : vector<8x128xf32>
    %7 = math.absf %0 : vector<8x128xf32>
    %cst_5 = arith.constant 0.000000e+00 : f32
    %8 = vector.broadcast %cst_5 : f32 to vector<8x128xf32>
    %9 = arith.subf %8, %7 : vector<8x128xf32>
    %10 = math.exp %9 : vector<8x128xf32>
    %11 = math.log1p %10 : vector<8x128xf32>
    %12 = arith.addf %6, %11 : vector<8x128xf32>
    %cst_6 = arith.constant 0.000000e+00 : f32
    %13 = vector.broadcast %cst_6 : f32 to vector<8x128xf32>
    %14 = arith.maximumf %1, %13 : vector<8x128xf32>
    %15 = arith.mulf %1, %2 : vector<8x128xf32>
    %16 = arith.subf %14, %15 : vector<8x128xf32>
    %17 = math.absf %1 : vector<8x128xf32>
    %cst_7 = arith.constant 0.000000e+00 : f32
    %18 = vector.broadcast %cst_7 : f32 to vector<8x128xf32>
    %19 = arith.subf %18, %17 : vector<8x128xf32>
    %20 = math.exp %19 : vector<8x128xf32>
    %21 = math.log1p %20 : vector<8x128xf32>
    %22 = arith.addf %16, %21 : vector<8x128xf32>
    %cst_8 = arith.constant dense<0.000000e+00> : vector<128xf32>
    %23 = vector.multi_reduction <add>, %12, %cst_8 [0] : vector<8x128xf32> to vector<128xf32>
    %24 = vector.shape_cast %23 : vector<128xf32> to vector<1x128xf32>
    %c0_9 = arith.constant 0 : index
    %c0_10 = arith.constant 0 : index
    %c0_11 = arith.constant 0 : index
    %25 = vector.load %arg4[%c0_9, %c0_10, %c0_11] : memref<1x2x128xf32, #tpu.memory_space<vmem>>, vector<1x1x128xf32>
    %26 = vector.shape_cast %25 : vector<1x1x128xf32> to vector<1x128xf32>
    %27 = vector.shape_cast %24 : vector<1x128xf32> to vector<1x1x128xf32>
    tpu.vector_store %arg4[%c0_9, %c0_10, %c0_11], %27 {strides = array<i32>} : memref<1x2x128xf32, #tpu.memory_space<vmem>>, vector<1x1x128xf32>,
    %cst_12 = arith.constant dense<0.000000e+00> : vector<128xf32>
    %28 = vector.multi_reduction <add>, %22, %cst_12 [0] : vector<8x128xf32> to vector<128xf32>
    %29 = vector.shape_cast %28 : vector<128xf32> to vector<1x128xf32>
    %c0_13 = arith.constant 0 : index
    %c1 = arith.constant 1 : index
    %c0_14 = arith.constant 0 : index
    %30 = vector.load %arg4[%c0_13, %c1, %c0_14] : memref<1x2x128xf32, #tpu.memory_space<vmem>>, vector<1x1x128xf32>
    %31 = vector.shape_cast %30 : vector<1x1x128xf32> to vector<1x128xf32>
    %32 = vector.shape_cast %29 : vector<1x128xf32> to vector<1x1x128xf32>
    tpu.vector_store %arg4[%c0_13, %c1, %c0_14], %32 {strides = array<i32>} : memref<1x2x128xf32, #tpu.memory_space<vmem>>, vector<1x1x128xf32>,
    return
  }
  func.func @transform_0(%arg0: i32) -> (i32, i32) {
    %c0_i32 = arith.constant 0 : i32
    %c0_i32_0 = arith.constant 0 : i32
    return %arg0, %c0_i32 : i32, i32
  }
  func.func @transform_1(%arg0: i32) -> (i32, i32) {
    %c0_i32 = arith.constant 0 : i32
    %c0_i32_0 = arith.constant 0 : i32
    return %arg0, %c0_i32 : i32, i32
  }
  func.func @transform_2(%arg0: i32) -> (i32, i32) {
    %c0_i32 = arith.constant 0 : i32
    %c0_i32_0 = arith.constant 0 : i32
    return %arg0, %c0_i32 : i32, i32
  }
  func.func @transform_3(%arg0: i32) -> (i32, i32, i32) {
    %c0_i32 = arith.constant 0 : i32
    %c0_i32_0 = arith.constant 0 : i32
    %c0_i32_1 = arith.constant 0 : i32
    return %arg0, %c0_i32, %c0_i32_0 : i32, i32, i32
  }
}

</mosaic_0001>

<bundles_post_ra>
// kernel: tpu_custom_call.1
= control target key start
LH: loop header
LB: loop body
LE: loop exit
PB: predicated region body
PF: predicated region fallthrough
CT: control target
= control target key end

     0   :  { %8 = vsyncpa [#allocation3], 0  ;;  %s295_s0 = inlined_call_operand.hbm [shape: f32[8,128], index: 0, kind: input, shape index: {}]   ;;  %s296_s1 = inlined_call_operand.hbm [shape: f32[8,128], index: 1, kind: input, shape index: {}]   ;;  %s297_s2 = inlined_call_operand.hbm [shape: f32[8,128], index: 2, kind: input, shape index: {}]   ;;  %s298_s3 = inlined_call_operand.hbm [shape: f32[1,2,128], index: 3, kind: output, shape index: {}]  }
   0x1   :  { %9 = vsyncpa [#allocation6], 0 }
   0x2   :  { %10 = vsyncpa [#allocation4], 0  ;;  %s223_s12 = smov [#allocation5]   ;;  %s224_s14 = smov [#allocation2]  }
   0x3   :  { %s27_s13 = sshll.u32 %s223_s12, 4  ;;  %s17_s15 = sshll.u32 %s224_s14, 4  ;;  %s28_s13 = int_to_ptr.vmem [resolvable:$true] %s27_s13  ;;  %s18_s15 = int_to_ptr.vmem [resolvable:$true] %s17_s15 }
   0x4   :  { %s129_s18 = scalar_lea.hbm %s296_s1, 128 }
   0x5   :  { %p130_p0 = scmp.ne.s32.totalorder %s296_s1, %s129_s18  ;;  %p133_p1 = scmp.lt.u32.totalorder %s129_s18, %s296_s1 }
   0x7   :  { %p135_p2 = pnand %p133_p1, %p130_p0 }
   0x9   :  { %138 = shalt.err (!%p135_p2)
}
   0xa   :  { %s139_s23 = scalar_lea.vmem %s28_s13, 128  ;;  %p144_p4 = scmp.lt.s32.totalorder %s28_s13, %s28_s13 }
   0xb   :  { %p140_p3 = scmp.ne.s32.totalorder %s28_s13, %s139_s23  ;;  %p145_p5 = scmp.lt.s32.totalorder %s139_s23, %s139_s23 }
   0xd   :  { %p146_p6 = por %p145_p5, %p144_p4 }
   0xf   :  { %p147_p7 = pnand %p146_p6, %p140_p3 }
  0x11   :  { %150 = shalt.err (!%p147_p7)
}
  0x12   :  { %30 = dma.hbm_to_vmem [thread:$0]  %s296_s1, 128, %s28_s13, [#allocation6]  }
  0x13   :  { %s151_s28 = scalar_lea.hbm %s295_s0, 128 }
  0x14   :  { %p152_p8 = scmp.ne.s32.totalorder %s295_s0, %s151_s28  ;;  %p155_p9 = scmp.lt.u32.totalorder %s151_s28, %s295_s0 }
  0x16   :  { %p157_p10 = pnand %p155_p9, %p152_p8 }
  0x18   :  { %160 = shalt.err (!%p157_p10)
}
  0x19   :  { %s161_s6 = scalar_lea.vmem %s18_s15, 128  ;;  %p166_p12 = scmp.lt.s32.totalorder %s18_s15, %s18_s15 }
  0x1a   :  { %p162_p11 = scmp.ne.s32.totalorder %s18_s15, %s161_s6  ;;  %p167_p13 = scmp.lt.s32.totalorder %s161_s6, %s161_s6 }
  0x1c   :  { %p168_p0 = por %p167_p13, %p166_p12 }
  0x1e   :  { %p169_p1 = pnand %p168_p0, %p162_p11 }
  0x20   :  { %172 = shalt.err (!%p169_p1)
}
  0x21   :  { %20 = dma.hbm_to_vmem [thread:$0]  %s295_s0, 128, %s18_s15, [#allocation3]  }
  0x22   :  { %s225_s8 = smov [#allocation7]   ;;  %s173_s12 = scalar_lea.hbm %s297_s2, 128 }
  0x23   :  { %s37_s9 = sshll.u32 %s225_s8, 4  ;;  %p174_p2 = scmp.ne.s32.totalorder %s297_s2, %s173_s12  ;;  %s38_s9 = int_to_ptr.vmem [resolvable:$true] %s37_s9 }
  0x24   :  { %p177_p3 = scmp.lt.u32.totalorder %s173_s12, %s297_s2 }
  0x26   :  { %p179_p4 = pnand %p177_p3, %p174_p2 }
  0x28   :  { %182 = shalt.err (!%p179_p4)
}
  0x29   :  { %s183_s18 = scalar_lea.vmem %s38_s9, 128  ;;  %p188_p6 = scmp.lt.s32.totalorder %s38_s9, %s38_s9 }
  0x2a   :  { %p184_p5 = scmp.ne.s32.totalorder %s38_s9, %s183_s18  ;;  %p189_p7 = scmp.lt.s32.totalorder %s183_s18, %s183_s18 }
  0x2c   :  { %p190_p8 = por %p189_p7, %p188_p6 }
  0x2e   :  { %p191_p9 = pnand %p190_p8, %p184_p5 }
  0x30   :  { %194 = shalt.err (!%p191_p9)
}
  0x31   :  { %40 = dma.hbm_to_vmem [thread:$0]  %s297_s2, 128, %s38_s9, [#allocation6]  }
  0x32   :  { %217 = dma.done.wait [#allocation3], 128  }
  0x33   :  { %218 = vsyncadd [#allocation3], 4294967168 }
  0x34   :  { %219 = dma.done.wait [#allocation6], 256  }
  0x35   :  { %220 = vsyncadd [#allocation6], 4294967040  ;;  %v50_v0 = vld [vmem:[#allocation2] sm:$0xff]  ;;  %v51_v1 = vld [vmem:[#allocation5] sm:$0xff]  ;;  %s226_s2 = smov [#allocation8]  }
  0x36   :  { %v56_v2 = vand.u32 2147483647, %v50_v0  ;;  %v73_v3 = vand.u32 2147483647, %v51_v1  ;;  %v52_v14 = vld [vmem:[#allocation7] sm:$0xff]  ;;  %v53_v16 = vmax.f32 %v50_v0, 0.0 }
  0x37   :  { %v54_v17 = vmul.f32 %v52_v14, %v50_v0  ;;  %v70_v20 = vmax.f32 %v51_v1, 0.0  ;;  %v71_v21 = vmul.f32 %v52_v14, %v51_v1  ;;  %s107_s19 = sshll.u32 %s226_s2, 4  ;;  %s108_s19 = int_to_ptr.vmem [resolvable:$true] %s107_s19 }
  0x38   :  { %v57_v4 = vsub.f32 0.0, %v56_v2  ;;  %v74_v5 = vsub.f32 0.0, %v73_v3  ;;  %s195_s20 = scalar_lea.vmem %s108_s19, 32  ;;  %p200_p11 = scmp.lt.s32.totalorder %s108_s19, %s108_s19 }
  0x39   :  { %v55_v25 = vsub.f32 %v53_v16, %v54_v17  ;;  %v72_v29 = vsub.f32 %v70_v20, %v71_v21  ;;  %p196_p10 = scmp.ne.s32.totalorder %s108_s19, %s195_s20  ;;  %p201_p12 = scmp.lt.s32.totalorder %s195_s20, %s195_s20 }
  0x3a   :  { %v58_v6 = vmul.f32 1.442695, %v57_v4  ;;  %v75_v7 = vmul.f32 1.442695, %v74_v5 }
  0x3b   :  { %p202_p13 = por %p201_p12, %p200_p11 }
  0x3c   :  { %121 = vpow2.f32 %v58_v6 }
  0x3d   :  { %123 = vpow2.f32 %v75_v7  ;;  %p203_p0 = pnand %p202_p13, %p196_p10 }
  0x46   :  { %v122_v8 = vpop.eup %121 }
  0x47   :  { %v124_v9 = vpop.eup %123  ;;  %v60_v10 = vadd.f32 1.0, %v122_v8  ;;  %v63_v12 = vmul.f32 -0.5, %v122_v8  ;;  %v66_v18 = vand.u32 2147483647, %v122_v8 }
  0x48   :  { %v77_v11 = vadd.f32 1.0, %v124_v9  ;;  %v80_v13 = vmul.f32 -0.5, %v124_v9  ;;  %v83_v22 = vand.u32 2147483647, %v124_v9 }
  0x49   :  { %125 = vlog2.f32 %v60_v10  ;;  %v64_v15 = vadd.f32 1.0, %v63_v12  ;;  %vm67_vm0 = vcmp.lt.f32.partialorder %v66_v18, 0.0004427343 }
  0x4a   :  { %127 = vlog2.f32 %v77_v11  ;;  %v81_v19 = vadd.f32 1.0, %v80_v13  ;;  %vm84_vm1 = vcmp.lt.f32.partialorder %v83_v22, 0.0004427343 }
  0x4b   :  { %v65_v23 = vmul.f32 %v122_v8, %v64_v15 }
  0x4c   :  { %v82_v26 = vmul.f32 %v124_v9, %v81_v19 }
  0x53   :  { %v126_v24 = vpop.eup %125 }
  0x54   :  { %v128_v27 = vpop.eup %127  ;;  %v62_v28 = vmul.f32 0.6931472, %v126_v24 }
  0x55   :  { %v79_v30 = vmul.f32 0.6931472, %v128_v27 }
  0x56   :  { %v68_v31 = vsel %vm67_vm0, %v65_v23, %v62_v28 }
  0x57   :  { %v69_v32 = vadd.f32 %v68_v31, %v55_v25  ;;  %v85_v33 = vsel %vm84_vm1, %v82_v26, %v79_v30 }
  0x58   :  { %v86_v34 = vadd.f32 %v85_v33, %v72_v29 }
  0x59   :  { %v87_v35 = vrot.slane %v69_v32, 4 }
  0x5a   :  { %v94_v36 = vrot.slane %v86_v34, 4 }
  0x5b   :  { %v88_v37 = vadd.f32 %v87_v35, %v69_v32 }
  0x5c   :  { %v95_v38 = vadd.f32 %v94_v36, %v86_v34 }
  0x5d   :  { %v89_v39 = vrot.slane %v88_v37, 2 }
  0x5e   :  { %v96_v40 = vrot.slane %v95_v38, 2 }
  0x5f   :  { %v90_v41 = vadd.f32 %v89_v39, %v88_v37 }
  0x60   :  { %v97_v42 = vadd.f32 %v96_v40, %v95_v38 }
  0x61   :  { %v91_v43 = vrot.slane %v90_v41, 1 }
  0x62   :  { %v98_v44 = vrot.slane %v97_v42, 1 }
  0x63   :  { %v92_v45 = vadd.f32 %v91_v43, %v90_v41 }
  0x64   :  { %v99_v46 = vadd.f32 %v98_v44, %v97_v42 }
  0x65   :  { %93 = vst [vmem:[#allocation8] sm:$0x1] %v92_v45 }
  0x66   :  { %100 = vst [vmem:[#allocation8 + $0x1] sm:$0x1] %v99_v46 }
  0x67   :  { %206 = shalt.err (!%p203_p0)
}
  0x68   :  { %s207_s23 = scalar_lea.hbm %s298_s3, 32 }
  0x69   :  { %p208_p1 = scmp.ne.s32.totalorder %s298_s3, %s207_s23  ;;  %p211_p2 = scmp.lt.u32.totalorder %s207_s23, %s298_s3 }
  0x6b   :  { %p213_p3 = pnand %p211_p2, %p208_p1 }
  0x6d   :  { %216 = shalt.err (!%p213_p3)
}
  0x6e   :  { %110 = dma.vmem_to_hbm [thread:$0]  %s108_s19, 32, %s298_s3, [#allocation4]  }
  0x6f   :  { %221 = dma.done.wait [#allocation4], 32  }
  0x70   :  { %222 = vsyncadd [#allocation4], 4294967264 }
  0x71   :  { %114 = vsyncpa [#allocation3], 1 }
  0x72   :  { %115 = vsyncpa [#allocation6], 1 }
  0x73   :  { %116 = vsyncpa [#allocation4], 1 }

</bundles_post_ra>
